<compile_context>
chip_gen: v5e
topology: v5e:2x2
jax: 0.10.0
libtpu: 0.0.40
codegen_flags: <defaults>
</compile_context>

<pallas_src>
import jax
import jax.numpy as jnp
from jax.experimental import pallas as pl
from jax.experimental.pallas import tpu as pltpu

HEAD_PAD = 128                       # lane-dense padded head width; cols 0..2 are real
_LAYER_SIZES = (512, 256, 128, 64)   # hidden widths of the 4 ReLU layers


def actor_kernel(x_ref,
                 w1_ref, b1_ref,
                 w2_ref, b2_ref,
                 w3_ref, b3_ref,
                 w4_ref, b4_ref,
                 wh_ref, bh_ref,
                 o_ref):
    """One batch tile: x (TB, state_dim) -> o (TB, HEAD_PAD); columns 0..2 are valid."""
    h = x_ref[...]

    def dense_relu(h, w_ref, b_ref):
        # MXU matmul with f32 accumulation; bias/ReLU in f32; re-narrow to the
        # weight dtype (bf16 in the fast path) to feed the next MXU op.
        z = jnp.dot(h, w_ref[...], preferred_element_type=jnp.float32)
        a = jnp.maximum(z + b_ref[...], 0.0)
        return a.astype(w_ref.dtype)

    h = dense_relu(h, w1_ref, b1_ref)   # (TB, 512)
    h = dense_relu(h, w2_ref, b2_ref)   # (TB, 256)
    h = dense_relu(h, w3_ref, b3_ref)   # (TB, 128)
    h = dense_relu(h, w4_ref, b4_ref)   # (TB, 64)

    z = jnp.dot(h, wh_ref[...], preferred_element_type=jnp.float32) + bh_ref[...]

    # col 0 -> sigmoid, col 1 -> tanh, col 2 -> sigmoid, cols >= 3 are padding
    # (discarded by the wrapper slice).  Single EUP pass: tanh(x) = 2*sigmoid(2x) - 1.
    # The 125 padded columns occupy the same vregs as 3 would and EUP/VPU have slack
    # under the MXU-bound loop, so this epilogue is free filler.
    col = jax.lax.broadcasted_iota(jnp.int32, z.shape, dimension=1)
    is_steer = col == 1
    s = jax.nn.sigmoid(jnp.where(is_steer, 2.0 * z, z))
    o_ref[...] = jnp.where(is_steer, 2.0 * s - 1.0, s).astype(o_ref.dtype)


def _round_up(n, m):
    return (n + m - 1) // m * m


def prepare_params(params, *, use_bf16=True):
    """Call-once weight preparation (hoisted out of the per-call path):
    fuse/zero-pad the three heads to a lane-dense (64, HEAD_PAD) slab and cast
    matmul weights to bf16 for the MXU.  Biases stay f32."""
    (w1, b1, w2, b2, w3, b3, w4, b4, wh, bh) = params
    wh_p = jnp.zeros((wh.shape[0], HEAD_PAD), jnp.float32).at[:, :wh.shape[1]].set(wh)
    bh_p = jnp.zeros((1, HEAD_PAD), jnp.float32).at[:, :bh.shape[1]].set(bh)
    if use_bf16:
        w1, w2, w3, w4, wh_p = (w.astype(jnp.bfloat16) for w in (w1, w2, w3, w4, wh_p))
    return (w1, b1, w2, b2, w3, b3, w4, b4, wh_p, bh_p)


def actor_forward(state, kparams, *, block_b=1024, use_bf16=True):
    """state: (B, state_dim) float32.  kparams: output of prepare_params().
    Returns (B, 3) float32 = [sigmoid(acc), tanh(steer), sigmoid(brake)]."""
    B, state_dim = state.shape
    (w1, b1, w2, b2, w3, b3, w4, b4, wh_p, bh_p) = kparams

    compute_dtype = jnp.bfloat16 if use_bf16 else jnp.float32
    state = state.astype(compute_dtype)   # halves the input DMA in the bf16 path

    # ---- batch tiling -------------------------------------------------------
    Bp8 = _round_up(B, 8)
    tb = min(block_b, Bp8)
    # Guarantee >= 2 grid steps when there is enough work so the "parallel" grid
    # axis actually gives v7x's two TensorCores a tile each (harmless on v5e/v6e).
    if Bp8 <= block_b and Bp8 > 8:
        tb = _round_up((Bp8 + 1) // 2, 8)
    Bp = _round_up(B, tb)
    if Bp != B:
        state = jnp.pad(state, ((0, Bp - B), (0, 0)))

    # Weights/biases: constant block index -> fetched once, VMEM-resident.
    # NOTE(synk): pipeline_mode=pl.Buffered(1) would shave their double-buffer
    # footprint (~0.4 MiB) but is skipped to avoid any lowering-support risk.
    resident = lambda a: pl.BlockSpec(a.shape, lambda i, _nd=a.ndim: (0,) * _nd)

    # Advisory cost for XLA scheduling around the custom call.
    sizes = (state_dim,) + _LAYER_SIZES + (HEAD_PAD,)
    flops = 2 * Bp * sum(a * b for a, b in zip(sizes[:-1], sizes[1:]))
    itemsize = 2 if use_bf16 else 4
    weight_bytes = sum(int(a.size) * a.dtype.itemsize
                       for a in (w1, b1, w2, b2, w3, b3, w4, b4, wh_p, bh_p))
    cost = pl.CostEstimate(
        flops=int(flops),
        transcendentals=int(Bp * HEAD_PAD),
        bytes_accessed=int(weight_bytes + Bp * (state_dim + HEAD_PAD) * itemsize))

    # v5e's default scoped VMEM is only 16 MiB; lift it for large batch tiles.
    vmem_limit = (32 * 1024 * 1024) if tb >= 1024 else None

    out = pl.pallas_call(
        actor_kernel,
        out_shape=jax.ShapeDtypeStruct((Bp, HEAD_PAD), compute_dtype),
        grid=(Bp // tb,),
        in_specs=[pl.BlockSpec((tb, state_dim), lambda i: (i, 0)),
                  resident(w1), resident(b1),
                  resident(w2), resident(b2),
                  resident(w3), resident(b3),
                  resident(w4), resident(b4),
                  resident(wh_p), resident(bh_p)],
        out_specs=pl.BlockSpec((tb, HEAD_PAD), lambda i: (i, 0)),
        compiler_params=pltpu.CompilerParams(
            dimension_semantics=("parallel",),
            vmem_limit_bytes=vmem_limit),
        cost_estimate=cost,
    )(state, w1, b1, w2, b2, w3, b3, w4, b4, wh_p, bh_p)

    # Drop padded batch rows and padded head columns; always return f32.
    return out[:B, :3].astype(jnp.float32)


def init_params(key, state_dim=17):
    """Deterministic init mimicking nn.Linear's U(-1/sqrt(fan_in), 1/sqrt(fan_in))."""
    sizes = (state_dim,) + _LAYER_SIZES
    params = []
    keys = jax.random.split(key, 2 * (len(sizes) - 1) + 2)
    ki = 0
    for i in range(len(sizes) - 1):
        fan_in, fan_out = sizes[i], sizes[i + 1]
        bound = 1.0 / jnp.sqrt(fan_in)
        w = jax.random.uniform(keys[ki], (fan_in, fan_out), jnp.float32, -bound, bound); ki += 1
        b = jax.random.uniform(keys[ki], (1, fan_out), jnp.float32, -bound, bound); ki += 1
        params += [w, b]
    # Heads: acceleration / steering / brake, each Linear(64, 1), fused -> (64, 3).
    bound = 1.0 / jnp.sqrt(64.0)
    wh = jax.random.uniform(keys[ki], (64, 3), jnp.float32, -bound, bound); ki += 1
    bh = jax.random.uniform(keys[ki], (1, 3), jnp.float32, -bound, bound); ki += 1
    params += [wh, bh]
    return tuple(params)


def actor_ref(state, params):
    """Pure-JAX f32 reference for sanity checking."""
    (w1, b1, w2, b2, w3, b3, w4, b4, wh, bh) = params
    x = jnp.maximum(state @ w1 + b1, 0.0)
    x = jnp.maximum(x @ w2 + b2, 0.0)
    x = jnp.maximum(x @ w3 + b3, 0.0)
    x = jnp.maximum(x @ w4 + b4, 0.0)
    z = x @ wh + bh
    acc = jax.nn.sigmoid(z[:, 0:1])
    steer = jnp.tanh(z[:, 1:2])
    brake = jax.nn.sigmoid(z[:, 2:3])
    return jnp.concatenate([acc, steer, brake], axis=-1)


if __name__ == "__main__":
    key = jax.random.PRNGKey(0)
    pkey, xkey1, xkey2 = jax.random.split(key, 3)

    state_dim = 17
    params = init_params(pkey, state_dim=state_dim)
    kparams_f32 = prepare_params(params, use_bf16=False)
    kparams_bf16 = prepare_params(params, use_bf16=True)

    # --- small batch, single grid step ---------------------------------------
    state_a = jax.random.normal(xkey1, (8, state_dim), dtype=jnp.float32)
    ref_a = actor_ref(state_a, params)

    out_f32 = jax.block_until_ready(actor_forward(state_a, kparams_f32, use_bf16=False))
    assert out_f32.shape == (8, 3), out_f32.shape
    assert jnp.allclose(out_f32, ref_a, atol=1e-3, rtol=1e-3), "f32 kernel mismatch vs reference"

    out_bf16 = jax.block_until_ready(actor_forward(state_a, kparams_bf16, use_bf16=True))
    assert out_bf16.shape == (8, 3), out_bf16.shape
    assert jnp.allclose(out_bf16, ref_a, atol=5e-2, rtol=5e-2), "bf16 kernel mismatch vs reference"

    # --- slightly larger batch: multi-step grid + batch padding --------------
    state_b = jax.random.normal(xkey2, (40, state_dim), dtype=jnp.float32)
    ref_b = actor_ref(state_b, params)

    out_b = jax.block_until_ready(actor_forward(state_b, kparams_bf16, use_bf16=True))
    assert out_b.shape == (40, 3), out_b.shape
    assert jnp.allclose(out_b, ref_b, atol=5e-2, rtol=5e-2), "tiled bf16 kernel mismatch vs reference"

    print("KERNEL_OK")
</pallas_src>

<mosaic_0001>
module attributes {stable_mosaic.version = 11 : i64} {
  func.func @actor_kernel(%arg0: i32, %arg1: memref<8x17xf32, #tpu.memory_space<vmem>>, %arg2: memref<17x512xf32, #tpu.memory_space<vmem>>, %arg3: memref<1x512xf32, #tpu.memory_space<vmem>>, %arg4: memref<512x256xf32, #tpu.memory_space<vmem>>, %arg5: memref<1x256xf32, #tpu.memory_space<vmem>>, %arg6: memref<256x128xf32, #tpu.memory_space<vmem>>, %arg7: memref<1x128xf32, #tpu.memory_space<vmem>>, %arg8: memref<128x64xf32, #tpu.memory_space<vmem>>, %arg9: memref<1x64xf32, #tpu.memory_space<vmem>>, %arg10: memref<64x128xf32, #tpu.memory_space<vmem>>, %arg11: memref<1x128xf32, #tpu.memory_space<vmem>>, %arg12: memref<8x128xf32, #tpu.memory_space<vmem>>) attributes {dimension_semantics = [#tpu.dimension_semantics<parallel>], iteration_bounds = array<i64: 1>, scalar_prefetch = 0 : i64, scratch_operands = 0 : i64, tpu.core_type = #tpu.core_type<tc>, window_params = [{transform_indices = @transform_0, window_bounds = array<i64: 8, 17>}, {pipeline_mode = #tpu.pipeline_mode<synchronous>, transform_indices = @transform_1, window_bounds = array<i64: 17, 512>}, {pipeline_mode = #tpu.pipeline_mode<synchronous>, transform_indices = @transform_2, window_bounds = array<i64: 1, 512>}, {pipeline_mode = #tpu.pipeline_mode<synchronous>, transform_indices = @transform_3, window_bounds = array<i64: 512, 256>}, {pipeline_mode = #tpu.pipeline_mode<synchronous>, transform_indices = @transform_4, window_bounds = array<i64: 1, 256>}, {pipeline_mode = #tpu.pipeline_mode<synchronous>, transform_indices = @transform_5, window_bounds = array<i64: 256, 128>}, {pipeline_mode = #tpu.pipeline_mode<synchronous>, transform_indices = @transform_6, window_bounds = array<i64: 1, 128>}, {pipeline_mode = #tpu.pipeline_mode<synchronous>, transform_indices = @transform_7, window_bounds = array<i64: 128, 64>}, {pipeline_mode = #tpu.pipeline_mode<synchronous>, transform_indices = @transform_8, window_bounds = array<i64: 1, 64>}, {pipeline_mode = #tpu.pipeline_mode<synchronous>, transform_indices = @transform_9, window_bounds = array<i64: 64, 128>}, {pipeline_mode = #tpu.pipeline_mode<synchronous>, transform_indices = @transform_10, window_bounds = array<i64: 1, 128>}, {transform_indices = @transform_11, window_bounds = array<i64: 8, 128>}]} {
    %c0 = arith.constant 0 : index
    %c0_0 = arith.constant 0 : index
    %0 = vector.load %arg1[%c0, %c0_0] : memref<8x17xf32, #tpu.memory_space<vmem>>, vector<8x17xf32>
    %c0_1 = arith.constant 0 : index
    %c0_2 = arith.constant 0 : index
    %1 = vector.load %arg2[%c0_1, %c0_2] : memref<17x512xf32, #tpu.memory_space<vmem>>, vector<17x512xf32>
    %cst = arith.constant dense<0.000000e+00> : vector<8x512xf32>
    %2 = tpu.matmul %0, %1, %cst {dimension_numbers = #tpu.dot_dimension_numbers<[1], [0], [0], [1], [0, 0, 1, 1], [], []>} : vector<8x17xf32>, vector<17x512xf32>, vector<8x512xf32> -> vector<8x512xf32>
    %c0_3 = arith.constant 0 : index
    %c0_4 = arith.constant 0 : index
    %3 = vector.load %arg3[%c0_3, %c0_4] : memref<1x512xf32, #tpu.memory_space<vmem>>, vector<1x512xf32>
    %4 = vector.broadcast %3 : vector<1x512xf32> to vector<8x512xf32>
    %5 = arith.addf %2, %4 : vector<8x512xf32>
    %cst_5 = arith.constant 0.000000e+00 : f32
    %6 = vector.broadcast %cst_5 : f32 to vector<8x512xf32>
    %7 = arith.maximumf %5, %6 : vector<8x512xf32>
    %c0_6 = arith.constant 0 : index
    %c0_7 = arith.constant 0 : index
    %8 = vector.load %arg4[%c0_6, %c0_7] : memref<512x256xf32, #tpu.memory_space<vmem>>, vector<512x256xf32>
    %cst_8 = arith.constant dense<0.000000e+00> : vector<8x256xf32>
    %9 = tpu.matmul %7, %8, %cst_8 {dimension_numbers = #tpu.dot_dimension_numbers<[1], [0], [0], [1], [0, 0, 1, 1], [], []>} : vector<8x512xf32>, vector<512x256xf32>, vector<8x256xf32> -> vector<8x256xf32>
    %c0_9 = arith.constant 0 : index
    %c0_10 = arith.constant 0 : index
    %10 = vector.load %arg5[%c0_9, %c0_10] : memref<1x256xf32, #tpu.memory_space<vmem>>, vector<1x256xf32>
    %11 = vector.broadcast %10 : vector<1x256xf32> to vector<8x256xf32>
    %12 = arith.addf %9, %11 : vector<8x256xf32>
    %cst_11 = arith.constant 0.000000e+00 : f32
    %13 = vector.broadcast %cst_11 : f32 to vector<8x256xf32>
    %14 = arith.maximumf %12, %13 : vector<8x256xf32>
    %c0_12 = arith.constant 0 : index
    %c0_13 = arith.constant 0 : index
    %15 = vector.load %arg6[%c0_12, %c0_13] : memref<256x128xf32, #tpu.memory_space<vmem>>, vector<256x128xf32>
    %cst_14 = arith.constant dense<0.000000e+00> : vector<8x128xf32>
    %16 = tpu.matmul %14, %15, %cst_14 {dimension_numbers = #tpu.dot_dimension_numbers<[1], [0], [0], [1], [0, 0, 1, 1], [], []>} : vector<8x256xf32>, vector<256x128xf32>, vector<8x128xf32> -> vector<8x128xf32>
    %c0_15 = arith.constant 0 : index
    %c0_16 = arith.constant 0 : index
    %17 = vector.load %arg7[%c0_15, %c0_16] : memref<1x128xf32, #tpu.memory_space<vmem>>, vector<1x128xf32>
    %18 = vector.broadcast %17 : vector<1x128xf32> to vector<8x128xf32>
    %19 = arith.addf %16, %18 : vector<8x128xf32>
    %cst_17 = arith.constant 0.000000e+00 : f32
    %20 = vector.broadcast %cst_17 : f32 to vector<8x128xf32>
    %21 = arith.maximumf %19, %20 : vector<8x128xf32>
    %c0_18 = arith.constant 0 : index
    %c0_19 = arith.constant 0 : index
    %22 = vector.load %arg8[%c0_18, %c0_19] : memref<128x64xf32, #tpu.memory_space<vmem>>, vector<128x64xf32>
    %cst_20 = arith.constant dense<0.000000e+00> : vector<8x64xf32>
    %23 = tpu.matmul %21, %22, %cst_20 {dimension_numbers = #tpu.dot_dimension_numbers<[1], [0], [0], [1], [0, 0, 1, 1], [], []>} : vector<8x128xf32>, vector<128x64xf32>, vector<8x64xf32> -> vector<8x64xf32>
    %c0_21 = arith.constant 0 : index
    %c0_22 = arith.constant 0 : index
    %24 = vector.load %arg9[%c0_21, %c0_22] : memref<1x64xf32, #tpu.memory_space<vmem>>, vector<1x64xf32>
    %25 = vector.broadcast %24 : vector<1x64xf32> to vector<8x64xf32>
    %26 = arith.addf %23, %25 : vector<8x64xf32>
    %cst_23 = arith.constant 0.000000e+00 : f32
    %27 = vector.broadcast %cst_23 : f32 to vector<8x64xf32>
    %28 = arith.maximumf %26, %27 : vector<8x64xf32>
    %c0_24 = arith.constant 0 : index
    %c0_25 = arith.constant 0 : index
    %29 = vector.load %arg10[%c0_24, %c0_25] : memref<64x128xf32, #tpu.memory_space<vmem>>, vector<64x128xf32>
    %cst_26 = arith.constant dense<0.000000e+00> : vector<8x128xf32>
    %30 = tpu.matmul %28, %29, %cst_26 {dimension_numbers = #tpu.dot_dimension_numbers<[1], [0], [0], [1], [0, 0, 1, 1], [], []>} : vector<8x64xf32>, vector<64x128xf32>, vector<8x128xf32> -> vector<8x128xf32>
    %c0_27 = arith.constant 0 : index
    %c0_28 = arith.constant 0 : index
    %31 = vector.load %arg11[%c0_27, %c0_28] : memref<1x128xf32, #tpu.memory_space<vmem>>, vector<1x128xf32>
    %32 = vector.broadcast %31 : vector<1x128xf32> to vector<8x128xf32>
    %33 = arith.addf %30, %32 : vector<8x128xf32>
    %34 = tpu.iota {dimensions = array<i32: 1>} : vector<8x128xi32>
    %c1_i32 = arith.constant 1 : i32
    %35 = vector.broadcast %c1_i32 : i32 to vector<8x128xi32>
    %36 = arith.cmpi eq, %34, %35 : vector<8x128xi32>
    %cst_29 = arith.constant 2.000000e+00 : f32
    %37 = vector.broadcast %cst_29 : f32 to vector<8x128xf32>
    %38 = arith.mulf %37, %33 : vector<8x128xf32>
    %39 = arith.select %36, %38, %33 : vector<8x128xi1>, vector<8x128xf32>
    %40 = arith.negf %39 : vector<8x128xf32>
    %41 = math.exp %40 : vector<8x128xf32>
    %cst_30 = arith.constant 1.000000e+00 : f32
    %42 = vector.broadcast %cst_30 : f32 to vector<8x128xf32>
    %43 = arith.addf %42, %41 : vector<8x128xf32>
    %44 = arith.divf %42, %43 : vector<8x128xf32>
    %cst_31 = arith.constant 2.000000e+00 : f32
    %45 = vector.broadcast %cst_31 : f32 to vector<8x128xf32>
    %46 = arith.mulf %45, %44 : vector<8x128xf32>
    %cst_32 = arith.constant 1.000000e+00 : f32
    %47 = vector.broadcast %cst_32 : f32 to vector<8x128xf32>
    %48 = arith.subf %46, %47 : vector<8x128xf32>
    %49 = arith.select %36, %48, %44 : vector<8x128xi1>, vector<8x128xf32>
    %c0_33 = arith.constant 0 : index
    %c0_34 = arith.constant 0 : index
    %50 = vector.load %arg12[%c0_33, %c0_34] : memref<8x128xf32, #tpu.memory_space<vmem>>, vector<8x128xf32>
    tpu.vector_store %arg12[%c0_33, %c0_34], %49 {strides = array<i32>} : memref<8x128xf32, #tpu.memory_space<vmem>>, vector<8x128xf32>,
    return
  }
  func.func @transform_0(%arg0: i32) -> (i32, i32) {
    %c0_i32 = arith.constant 0 : i32
    %c0_i32_0 = arith.constant 0 : i32
    return %arg0, %c0_i32 : i32, i32
  }
  func.func @transform_1(%arg0: i32) -> (i32, i32) {
    %c0_i32 = arith.constant 0 : i32
    %c0_i32_0 = arith.constant 0 : i32
    %c0_i32_1 = arith.constant 0 : i32
    return %c0_i32, %c0_i32_0 : i32, i32
  }
  func.func @transform_2(%arg0: i32) -> (i32, i32) {
    %c0_i32 = arith.constant 0 : i32
    %c0_i32_0 = arith.constant 0 : i32
    %c0_i32_1 = arith.constant 0 : i32
    return %c0_i32, %c0_i32_0 : i32, i32
  }
  func.func @transform_3(%arg0: i32) -> (i32, i32) {
    %c0_i32 = arith.constant 0 : i32
    %c0_i32_0 = arith.constant 0 : i32
    %c0_i32_1 = arith.constant 0 : i32
    return %c0_i32, %c0_i32_0 : i32, i32
  }
  func.func @transform_4(%arg0: i32) -> (i32, i32) {
    %c0_i32 = arith.constant 0 : i32
    %c0_i32_0 = arith.constant 0 : i32
    %c0_i32_1 = arith.constant 0 : i32
    return %c0_i32, %c0_i32_0 : i32, i32
  }
  func.func @transform_5(%arg0: i32) -> (i32, i32) {
    %c0_i32 = arith.constant 0 : i32
    %c0_i32_0 = arith.constant 0 : i32
    %c0_i32_1 = arith.constant 0 : i32
    return %c0_i32, %c0_i32_0 : i32, i32
  }
  func.func @transform_6(%arg0: i32) -> (i32, i32) {
    %c0_i32 = arith.constant 0 : i32
    %c0_i32_0 = arith.constant 0 : i32
    %c0_i32_1 = arith.constant 0 : i32
    return %c0_i32, %c0_i32_0 : i32, i32
  }
  func.func @transform_7(%arg0: i32) -> (i32, i32) {
    %c0_i32 = arith.constant 0 : i32
    %c0_i32_0 = arith.constant 0 : i32
    %c0_i32_1 = arith.constant 0 : i32
    return %c0_i32, %c0_i32_0 : i32, i32
  }
  func.func @transform_8(%arg0: i32) -> (i32, i32) {
    %c0_i32 = arith.constant 0 : i32
    %c0_i32_0 = arith.constant 0 : i32
    %c0_i32_1 = arith.constant 0 : i32
    return %c0_i32, %c0_i32_0 : i32, i32
  }
  func.func @transform_9(%arg0: i32) -> (i32, i32) {
    %c0_i32 = arith.constant 0 : i32
    %c0_i32_0 = arith.constant 0 : i32
    %c0_i32_1 = arith.constant 0 : i32
    return %c0_i32, %c0_i32_0 : i32, i32
  }
  func.func @transform_10(%arg0: i32) -> (i32, i32) {
    %c0_i32 = arith.constant 0 : i32
    %c0_i32_0 = arith.constant 0 : i32
    %c0_i32_1 = arith.constant 0 : i32
    return %c0_i32, %c0_i32_0 : i32, i32
  }
  func.func @transform_11(%arg0: i32) -> (i32, i32) {
    %c0_i32 = arith.constant 0 : i32
    %c0_i32_0 = arith.constant 0 : i32
    return %arg0, %c0_i32 : i32, i32
  }
}

</mosaic_0001>

<bundles_post_ra>
// kernel: tpu_custom_call.1
= control target key start
LH: loop header
LB: loop body
LE: loop exit
PB: predicated region body
PF: predicated region fallthrough
CT: control target
= control target key end

     0   :  { %16 = vsyncpa [#allocation3], 0  ;;  %s1006_s0 = inlined_call_operand.vmem [shape: f32[8,17], index: 0, kind: input, shape index: {}]   ;;  %s1007_s1 = inlined_call_operand.vmem [shape: f32[17,512], index: 1, kind: input, shape index: {}]   ;;  %s1008_s2 = inlined_call_operand.vmem [shape: f32[1,512], index: 2, kind: input, shape index: {}]   ;;  %s1009_s3 = inlined_call_operand.hbm [shape: f32[512,256], index: 3, kind: input, shape index: {}]   ;;  %s1010_s4 = inlined_call_operand.vmem [shape: f32[1,256], index: 4, kind: input, shape index: {}]   ;;  %s1011_s5 = inlined_call_operand.hbm [shape: f32[256,128], index: 5, kind: input, shape index: {}]   ;;  %s1012_s6 = inlined_call_operand.vmem [shape: f32[1,128], index: 6, kind: input, shape index: {}]   ;;  %s1013_s7 = inlined_call_operand.vmem [shape: f32[128,64], index: 7, kind: input, shape index: {}]   ;;  %s1014_s8 = inlined_call_operand.vmem [shape: f32[1,64], index: 8, kind: input, shape index: {}]   ;;  %s1015_s9 = inlined_call_operand.vmem [shape: f32[64,128], index: 9, kind: input, shape index: {}]   ;;  %s1016_s10 = inlined_call_operand.vmem [shape: f32[1,128], index: 10, kind: input, shape index: {}]   ;;  %s1017_s11 = inlined_call_operand.hbm [shape: f32[8,128], index: 11, kind: output, shape index: {}]  }
   0x1   :  { %17 = vsyncpa [#allocation6], 0 }
   0x2   :  { %18 = vsyncpa [#allocation4], 0  ;;  %s29_s19 = sshll.u32 %s1009_s3, 4  ;;  %s794_s20 = smov [#allocation2]   ;;  %s30_s19 = int_to_ptr.hbm [resolvable:$true] %s29_s19 }
   0x3   :  { %s31_s21 = sshll.u32 %s794_s20, 4  ;;  %s44_s24 = sshll.u32 %s1011_s5, 4  ;;  %s32_s21 = int_to_ptr.vmem [resolvable:$true] %s31_s21  ;;  %s45_s24 = int_to_ptr.hbm [resolvable:$true] %s44_s24 }
   0x4   :  { %s795_s25 = smov 256   ;;  %s796_s26 = smov 16  }
   0x5   :  { %37 = dma.hbm_to_vmem [thread:$0]  %s30_s19, 16384, %s32_s21, [#allocation3], %s795_s25, %s795_s25, %s796_s26  }
   0x6   :  { %s797_s27 = smov [#allocation5]   ;;  %s798_s29 = smov 128  }
   0x7   :  { %s46_s28 = sshll.u32 %s797_s27, 4  ;;  %s799_s30 = smov 8   ;;  %s47_s28 = int_to_ptr.vmem [resolvable:$true] %s46_s28 }
   0x8   :  { %52 = dma.hbm_to_vmem [thread:$0]  %s45_s24, 4096, %s47_s28, [#allocation6], %s798_s29, %s798_s29, %s799_s30  }
   0x9   :  { %788 = dma.done.wait [#allocation3], 16384  }
   0xa   :  { %789 = vsyncadd [#allocation3], 4294950912 }
   0xb   :  { %790 = dma.done.wait [#allocation6], 4096  }
   0xc   :  { %791 = vsyncadd [#allocation6], 4294963200  ;;  %vm98_vm0 = vcmask 1040384   ;;  %v80_v0 = vld [vmem:[%s1007_s1 + $0x40] sm:$0x1]  ;;  %v78_v3 = vld [vmem:[%s1007_s1 + $0x30] sm:$0xff] }
   0xd   :  { %v82_v1 = vld [vmem:[%s1007_s1 + $0x50] sm:$0x1]  ;;  %v76_v2 = vld [vmem:[%s1007_s1 + $0x20] sm:$0xff]  ;;  %691 = vmatpush.msk.msra.mxu3 %vm98_vm0, %v80_v0  ;;  %v81_v6 = vld [vmem:[%s1007_s1 + $0x48] sm:$0x1]  ;;  %vm94_vm1 = vcmask 138240  }
   0xe   :  { %695 = vmatpush.msk.msra.mxu2 %vm98_vm0, %v82_v1  ;;  %v72_v4 = vld [vmem:[%s1007_s1] sm:$0xff]  ;;  %v74_v5 = vld [vmem:[%s1007_s1 + $0x10] sm:$0xff]  ;;  %v83_v8 = vld [vmem:[%s1007_s1 + $0x58] sm:$0x1]  ;;  %693 = vmatpush.msk.msra.mxu1 %vm98_vm0, %v81_v6  ;;  %vm621_vm2 = vcmask 523264   ;;  %s680_s19 = sshll.u32 %s1017_s11, 4  ;;  %s681_s19 = int_to_ptr.hbm [resolvable:$true] %s680_s19 }
   0xf   :  { %125 = vmatpush.msra.mxu3 %v76_v2  ;;  %v71_v7 = vld [vmem:[%s1006_s0] sm:$0xff]  ;;  %v77_v9 = vld [vmem:[%s1007_s1 + $0x28] sm:$0xff]  ;;  %v225_v10 = vld [vmem:[#allocation2 + $0xf0] sm:$0xff] }
  0x10   :  { %165 = vmatpush.msra.mxu2 %v78_v3  ;;  %v289_v11 = vld [vmem:[#allocation2 + $0x2f0] sm:$0xff]  ;;  %v79_v12 = vld [vmem:[%s1007_s1 + $0x38] sm:$0xff]  ;;  %v73_v13 = vld [vmem:[%s1007_s1 + $0x8] sm:$0xff]  ;;  %145 = vmatpush.msra.mxu1 %v77_v9 }
  0x11   :  { %126 = vmatpush.msra.mxu3 %v72_v4  ;;  %v223_v14 = vld [vmem:[#allocation2 + $0xe0] sm:$0xff]  ;;  %v75_v15 = vld [vmem:[%s1007_s1 + $0x18] sm:$0xff]  ;;  %329 = vmatpush.msra.mxu0 %v225_v10  ;;  %v257_v16 = vld [vmem:[#allocation2 + $0x1f0] sm:$0xff] }
  0x12   :  { %166 = vmatpush.msra.mxu2 %v74_v5  ;;  %692 = vmatmul.msk.f32.vlgmr.msra.gmra.mxu3 %vm94_vm1, %v71_v7  ;;  %v287_v17 = vld [vmem:[#allocation2 + $0x2e0] sm:$0xff]  ;;  %v221_v18 = vld [vmem:[#allocation2 + $0xd0] sm:$0xff]  ;;  %v226_v9 = vld [vmem:[#allocation2 + $0xf8] sm:$0xff] }
  0x13   :  { %696 = vmatmul.msk.f32.vlgmr.msra.gmra.mxu2 %vm94_vm1, %v71_v7  ;;  %697 = vmatpush.msk.msrb.mxu3 %vm98_vm0, %v83_v8  ;;  %v255_v19 = vld [vmem:[#allocation2 + $0x1e0] sm:$0xff]  ;;  %v321_v20 = vld [vmem:[#allocation2 + $0x3f0] sm:$0xff]  ;;  %v290_v10 = vld [vmem:[#allocation2 + $0x2f8] sm:$0xff] }
  0x14   :  { %369 = vmatpush.msrb.mxu2 %v289_v11  ;;  %146 = vmatpush.msra.mxu1 %v73_v13  ;;  %v285_v21 = vld [vmem:[#allocation2 + $0x2d0] sm:$0xff]  ;;  %v219_v22 = vld [vmem:[#allocation2 + $0xc0] sm:$0xff]  ;;  %v258_v13 = vld [vmem:[#allocation2 + $0x1f8] sm:$0xff] }
  0x15   :  { %185 = vmatpush.msrb.mxu3 %v79_v12  ;;  %694 = vmatmul.msk.f32.vlgmr.msra.gmra.mxu1 %vm94_vm1, %v71_v7  ;;  %v253_v23 = vld [vmem:[#allocation2 + $0x1d0] sm:$0xff]  ;;  %v283_v24 = vld [vmem:[#allocation2 + $0x2c0] sm:$0xff]  ;;  %v224_v12 = vld [vmem:[#allocation2 + $0xe8] sm:$0xff] }
  0x16   :  { %330 = vmatpush.msra.mxu0 %v223_v14  ;;  %349 = vmatpush.msrb.mxu1 %v257_v16  ;;  %v319_v25 = vld [vmem:[#allocation2 + $0x3e0] sm:$0xff]  ;;  %v217_v26 = vld [vmem:[#allocation2 + $0xb0] sm:$0xff]  ;;  %v288_v14 = vld [vmem:[#allocation2 + $0x2e8] sm:$0xff] }
  0x17   :  { %186 = vmatpush.msrb.mxu3 %v75_v15  ;;  %370 = vmatpush.msrb.mxu2 %v287_v17  ;;  %v251_v27 = vld [vmem:[#allocation2 + $0x1c0] sm:$0xff]  ;;  %v281_v28 = vld [vmem:[#allocation2 + $0x2b0] sm:$0xff]  ;;  %v222_v16 = vld [vmem:[#allocation2 + $0xd8] sm:$0xff] }
  0x18   :  { %331 = vmatpush.msra.mxu0 %v221_v18  ;;  %350 = vmatpush.msrb.mxu1 %v255_v19  ;;  %v317_v29 = vld [vmem:[#allocation2 + $0x3d0] sm:$0xff]  ;;  %v215_v30 = vld [vmem:[#allocation2 + $0xa0] sm:$0xff]  ;;  %v256_v17 = vld [vmem:[#allocation2 + $0x1e8] sm:$0xff] }
  0x19   :  { %389 = vmatpush.msra.mxu3 %v321_v20  ;;  %371 = vmatpush.msrb.mxu2 %v285_v21  ;;  %v249_v31 = vld [vmem:[#allocation2 + $0x1b0] sm:$0xff]  ;;  %v279_v32 = vld [vmem:[#allocation2 + $0x2a0] sm:$0xff]  ;;  %v286_v18 = vld [vmem:[#allocation2 + $0x2d8] sm:$0xff] }
  0x1a   :  { %698 = vmatmul.msk.f32.vlgmr.msrb.gmra.mxu3 %vm94_vm1, %v71_v7  ;;  %332 = vmatpush.msra.mxu0 %v219_v22  ;;  %v315_v33 = vld [vmem:[#allocation2 + $0x3c0] sm:$0xff]  ;;  %v213_v34 = vld [vmem:[#allocation2 + $0x90] sm:$0xff]  ;;  %v220_v20 = vld [vmem:[#allocation2 + $0xc8] sm:$0xff] }
  0x1b   :  { %351 = vmatpush.msrb.mxu1 %v253_v23  ;;  %372 = vmatpush.msrb.mxu2 %v283_v24  ;;  %v247_v35 = vld [vmem:[#allocation2 + $0x1a0] sm:$0xff]  ;;  %v277_v36 = vld [vmem:[#allocation2 + $0x290] sm:$0xff]  ;;  %v254_v21 = vld [vmem:[#allocation2 + $0x1d8] sm:$0xff] }
  0x1c   :  { %390 = vmatpush.msra.mxu3 %v319_v25  ;;  %333 = vmatpush.msra.mxu0 %v217_v26  ;;  %v313_v37 = vld [vmem:[#allocation2 + $0x3b0] sm:$0xff]  ;;  %v211_v38 = vld [vmem:[#allocation2 + $0x80] sm:$0xff]  ;;  %v284_v22 = vld [vmem:[#allocation2 + $0x2c8] sm:$0xff] }
  0x1d   :  { %352 = vmatpush.msrb.mxu1 %v251_v27  ;;  %373 = vmatpush.msrb.mxu2 %v281_v28  ;;  %v245_v39 = vld [vmem:[#allocation2 + $0x190] sm:$0xff]  ;;  %v275_v40 = vld [vmem:[#allocation2 + $0x280] sm:$0xff]  ;;  %v218_v24 = vld [vmem:[#allocation2 + $0xb8] sm:$0xff] }
  0x1e   :  { %391 = vmatpush.msra.mxu3 %v317_v29  ;;  %334 = vmatpush.msra.mxu0 %v215_v30  ;;  %v311_v41 = vld [vmem:[#allocation2 + $0x3a0] sm:$0xff]  ;;  %v209_v42 = vld [vmem:[#allocation2 + $0x70] sm:$0xff]  ;;  %v252_v25 = vld [vmem:[#allocation2 + $0x1c8] sm:$0xff] }
  0x1f   :  { %353 = vmatpush.msrb.mxu1 %v249_v31  ;;  %374 = vmatpush.msrb.mxu2 %v279_v32  ;;  %v243_v43 = vld [vmem:[#allocation2 + $0x180] sm:$0xff]  ;;  %v273_v44 = vld [vmem:[#allocation2 + $0x270] sm:$0xff]  ;;  %v282_v26 = vld [vmem:[#allocation2 + $0x2b8] sm:$0xff] }
  0x20   :  { %392 = vmatpush.msra.mxu3 %v315_v33  ;;  %335 = vmatpush.msra.mxu0 %v213_v34  ;;  %v309_v45 = vld [vmem:[#allocation2 + $0x390] sm:$0xff]  ;;  %v207_v46 = vld [vmem:[#allocation2 + $0x60] sm:$0xff]  ;;  %v322_v27 = vld [vmem:[#allocation2 + $0x3f8] sm:$0xff] }
  0x21   :  { %354 = vmatpush.msrb.mxu1 %v247_v35  ;;  %375 = vmatpush.msrb.mxu2 %v277_v36  ;;  %v241_v47 = vld [vmem:[#allocation2 + $0x170] sm:$0xff]  ;;  %v271_v48 = vld [vmem:[#allocation2 + $0x260] sm:$0xff]  ;;  %v216_v28 = vld [vmem:[#allocation2 + $0xa8] sm:$0xff] }
  0x22   :  { %393 = vmatpush.msra.mxu3 %v313_v37  ;;  %336 = vmatpush.msra.mxu0 %v211_v38  ;;  %v307_v49 = vld [vmem:[#allocation2 + $0x380] sm:$0xff]  ;;  %v205_v50 = vld [vmem:[#allocation2 + $0x50] sm:$0xff]  ;;  %v250_v29 = vld [vmem:[#allocation2 + $0x1b8] sm:$0xff] }
  0x23   :  { %355 = vmatpush.msrb.mxu1 %v245_v39  ;;  %376 = vmatpush.msrb.mxu2 %v275_v40  ;;  %v239_v51 = vld [vmem:[#allocation2 + $0x160] sm:$0xff]  ;;  %v269_v52 = vld [vmem:[#allocation2 + $0x250] sm:$0xff]  ;;  %v280_v30 = vld [vmem:[#allocation2 + $0x2a8] sm:$0xff] }
  0x24   :  { %394 = vmatpush.msra.mxu3 %v311_v41  ;;  %337 = vmatpush.msra.mxu0 %v209_v42  ;;  %v305_v53 = vld [vmem:[#allocation2 + $0x370] sm:$0xff]  ;;  %v203_v54 = vld [vmem:[#allocation2 + $0x40] sm:$0xff]  ;;  %v320_v31 = vld [vmem:[#allocation2 + $0x3e8] sm:$0xff] }
  0x25   :  { %356 = vmatpush.msrb.mxu1 %v243_v43  ;;  %377 = vmatpush.msrb.mxu2 %v273_v44  ;;  %v237_v55 = vld [vmem:[#allocation2 + $0x150] sm:$0xff]  ;;  %v267_v56 = vld [vmem:[#allocation2 + $0x240] sm:$0xff]  ;;  %v214_v32 = vld [vmem:[#allocation2 + $0x98] sm:$0xff] }
  0x26   :  { %395 = vmatpush.msra.mxu3 %v309_v45  ;;  %338 = vmatpush.msra.mxu0 %v207_v46  ;;  %v303_v57 = vld [vmem:[#allocation2 + $0x360] sm:$0xff]  ;;  %v201_v58 = vld [vmem:[#allocation2 + $0x30] sm:$0xff]  ;;  %v248_v33 = vld [vmem:[#allocation2 + $0x1a8] sm:$0xff] }
  0x27   :  { %357 = vmatpush.msrb.mxu1 %v241_v47  ;;  %378 = vmatpush.msrb.mxu2 %v271_v48  ;;  %v235_v59 = vld [vmem:[#allocation2 + $0x140] sm:$0xff]  ;;  %v265_v60 = vld [vmem:[#allocation2 + $0x230] sm:$0xff]  ;;  %v278_v34 = vld [vmem:[#allocation2 + $0x298] sm:$0xff] }
  0x28   :  { %396 = vmatpush.msra.mxu3 %v307_v49  ;;  %339 = vmatpush.msra.mxu0 %v205_v50  ;;  %v301_v61 = vld [vmem:[#allocation2 + $0x350] sm:$0xff]  ;;  %v199_v62 = vld [vmem:[#allocation2 + $0x20] sm:$0xff]  ;;  %v318_v35 = vld [vmem:[#allocation2 + $0x3d8] sm:$0xff] }
  0x29   :  { %358 = vmatpush.msrb.mxu1 %v239_v51  ;;  %379 = vmatpush.msrb.mxu2 %v269_v52  ;;  %v233_v63 = vld [vmem:[#allocation2 + $0x130] sm:$0xff]  ;;  %v263_v0 = vld [vmem:[#allocation2 + $0x220] sm:$0xff]  ;;  %v212_v36 = vld [vmem:[#allocation2 + $0x88] sm:$0xff] }
  0x2a   :  { %397 = vmatpush.msra.mxu3 %v305_v53  ;;  %340 = vmatpush.msra.mxu0 %v203_v54  ;;  %v299_v1 = vld [vmem:[#allocation2 + $0x340] sm:$0xff]  ;;  %v197_v2 = vld [vmem:[#allocation2 + $0x10] sm:$0xff]  ;;  %v246_v37 = vld [vmem:[#allocation2 + $0x198] sm:$0xff] }
  0x2b   :  { %359 = vmatpush.msrb.mxu1 %v237_v55  ;;  %380 = vmatpush.msrb.mxu2 %v267_v56  ;;  %v231_v3 = vld [vmem:[#allocation2 + $0x120] sm:$0xff]  ;;  %v261_v4 = vld [vmem:[#allocation2 + $0x210] sm:$0xff]  ;;  %v276_v38 = vld [vmem:[#allocation2 + $0x288] sm:$0xff] }
  0x2c   :  { %398 = vmatpush.msra.mxu3 %v303_v57  ;;  %341 = vmatpush.msra.mxu0 %v201_v58  ;;  %v195_v5 = vld [vmem:[#allocation2] sm:$0xff]  ;;  %v297_v6 = vld [vmem:[#allocation2 + $0x330] sm:$0xff]  ;;  %v316_v39 = vld [vmem:[#allocation2 + $0x3c8] sm:$0xff] }
  0x2d   :  { %360 = vmatpush.msrb.mxu1 %v235_v59  ;;  %381 = vmatpush.msrb.mxu2 %v265_v60  ;;  %v229_v7 = vld [vmem:[#allocation2 + $0x110] sm:$0xff]  ;;  %v259_v8 = vld [vmem:[#allocation2 + $0x200] sm:$0xff]  ;;  %v210_v40 = vld [vmem:[#allocation2 + $0x78] sm:$0xff] }
  0x2e   :  { %399 = vmatpush.msra.mxu3 %v301_v61  ;;  %342 = vmatpush.msra.mxu0 %v199_v62  ;;  %v227_v11 = vld [vmem:[#allocation2 + $0x100] sm:$0xff]  ;;  %v293_v19 = vld [vmem:[#allocation2 + $0x310] sm:$0xff]  ;;  %v244_v41 = vld [vmem:[#allocation2 + $0x188] sm:$0xff] }
  0x2f   :  { %361 = vmatpush.msrb.mxu1 %v233_v63  ;;  %382 = vmatpush.msrb.mxu2 %v263_v0  ;;  %v295_v15 = vld [vmem:[#allocation2 + $0x320] sm:$0xff]  ;;  %v274_v42 = vld [vmem:[#allocation2 + $0x278] sm:$0xff]  ;;  %v208_v44 = vld [vmem:[#allocation2 + $0x68] sm:$0xff] }
  0x30   :  { %400 = vmatpush.msra.mxu3 %v299_v1  ;;  %343 = vmatpush.msra.mxu0 %v197_v2  ;;  %v291_v23 = vld [vmem:[#allocation2 + $0x300] sm:$0xff]  ;;  %v314_v43 = vld [vmem:[#allocation2 + $0x3b8] sm:$0xff]  ;;  %v272_v46 = vld [vmem:[#allocation2 + $0x268] sm:$0xff] }
  0x31   :  { %362 = vmatpush.msrb.mxu1 %v231_v3  ;;  %383 = vmatpush.msrb.mxu2 %v261_v4  ;;  %v242_v45 = vld [vmem:[#allocation2 + $0x178] sm:$0xff]  ;;  %v312_v47 = vld [vmem:[#allocation2 + $0x3a8] sm:$0xff] }
  0x32   :  { %401 = vmatpush.msra.mxu3 %v297_v6  ;;  %344 = vmatpush.msra.mxu0 %v195_v5  ;;  %v206_v48 = vld [vmem:[#allocation2 + $0x58] sm:$0xff]  ;;  %v240_v49 = vld [vmem:[#allocation2 + $0x168] sm:$0xff] }
  0x33   :  { %363 = vmatpush.msrb.mxu1 %v229_v7  ;;  %384 = vmatpush.msrb.mxu2 %v259_v8  ;;  %v270_v50 = vld [vmem:[#allocation2 + $0x258] sm:$0xff]  ;;  %v204_v52 = vld [vmem:[#allocation2 + $0x48] sm:$0xff] }
  0x34   :  { %409 = vmatpush.msrb.mxu0 %v226_v9  ;;  %402 = vmatpush.msra.mxu3 %v295_v15  ;;  %v310_v51 = vld [vmem:[#allocation2 + $0x398] sm:$0xff]  ;;  %v268_v54 = vld [vmem:[#allocation2 + $0x248] sm:$0xff] }
  0x35   :  { %449 = vmatpush.msra.mxu2 %v290_v10  ;;  %364 = vmatpush.msrb.mxu1 %v227_v11  ;;  %v238_v53 = vld [vmem:[#allocation2 + $0x158] sm:$0xff]  ;;  %v308_v55 = vld [vmem:[#allocation2 + $0x388] sm:$0xff] }
  0x36   :  { %410 = vmatpush.msrb.mxu0 %v224_v12  ;;  %403 = vmatpush.msra.mxu3 %v293_v19  ;;  %v202_v56 = vld [vmem:[#allocation2 + $0x38] sm:$0xff]  ;;  %v236_v57 = vld [vmem:[#allocation2 + $0x148] sm:$0xff] }
  0x37   :  { %429 = vmatpush.msra.mxu1 %v258_v13  ;;  %450 = vmatpush.msra.mxu2 %v288_v14  ;;  %v266_v58 = vld [vmem:[#allocation2 + $0x238] sm:$0xff]  ;;  %v200_v60 = vld [vmem:[#allocation2 + $0x28] sm:$0xff]  ;;  %v84_v13 = vld [vmem:[%s1008_s2] sm:$0xf] }
  0x38   :  { %411 = vmatpush.msrb.mxu0 %v222_v16  ;;  %404 = vmatpush.msra.mxu3 %v291_v23  ;;  %v306_v59 = vld [vmem:[#allocation2 + $0x378] sm:$0xff]  ;;  %v264_v62 = vld [vmem:[#allocation2 + $0x228] sm:$0xff]  ;;  %v87_v14 = vperm.slane %v84_v13, 1  ;;  %v86_v15 = vperm.slane %v84_v13, 0  ;;  %v88_v16 = vperm.slane %v84_v13, 2 }
  0x39   :  { %430 = vmatpush.msra.mxu1 %v256_v17  ;;  %451 = vmatpush.msra.mxu2 %v286_v18  ;;  %v234_v61 = vld [vmem:[#allocation2 + $0x138] sm:$0xff]  ;;  %v304_v63 = vld [vmem:[#allocation2 + $0x368] sm:$0xff] }
  0x3a   :  { %412 = vmatpush.msrb.mxu0 %v220_v20  ;;  %469 = vmatpush.msrb.mxu3 %v322_v27  ;;  %v198_v0 = vld [vmem:[#allocation2 + $0x18] sm:$0xff]  ;;  %v232_v1 = vld [vmem:[#allocation2 + $0x128] sm:$0xff] }
  0x3b   :  { %431 = vmatpush.msra.mxu1 %v254_v21  ;;  %452 = vmatpush.msra.mxu2 %v284_v22  ;;  %v262_v2 = vld [vmem:[#allocation2 + $0x218] sm:$0xff]  ;;  %v196_v4 = vld [vmem:[#allocation2 + $0x8] sm:$0xff] }
  0x3c   :  { %413 = vmatpush.msrb.mxu0 %v218_v24  ;;  %470 = vmatpush.msrb.mxu3 %v320_v31  ;;  %v302_v3 = vld [vmem:[#allocation2 + $0x358] sm:$0xff]  ;;  %v260_v6 = vld [vmem:[#allocation2 + $0x208] sm:$0xff] }
  0x3d   :  { %432 = vmatpush.msra.mxu1 %v252_v25  ;;  %453 = vmatpush.msra.mxu2 %v282_v26  ;;  %v230_v5 = vld [vmem:[#allocation2 + $0x118] sm:$0xff]  ;;  %v300_v7 = vld [vmem:[#allocation2 + $0x348] sm:$0xff] }
  0x3e   :  { %414 = vmatpush.msrb.mxu0 %v216_v28  ;;  %471 = vmatpush.msrb.mxu3 %v318_v35  ;;  %v228_v8 = vld [vmem:[#allocation2 + $0x108] sm:$0xff]  ;;  %v298_v9 = vld [vmem:[#allocation2 + $0x338] sm:$0xff]  ;;  %v521_v28 = vld [vmem:[#allocation5 + $0xf0] sm:$0xff] }
  0x3f   :  { %433 = vmatpush.msra.mxu1 %v250_v29  ;;  %454 = vmatpush.msra.mxu2 %v280_v30  ;;  %v296_v10 = vld [vmem:[#allocation2 + $0x328] sm:$0xff]  ;;  %v294_v11 = vld [vmem:[#allocation2 + $0x318] sm:$0xff]  ;;  %v89_v29 = vperm.slane %v84_v13, 3  ;;  %v505_v30 = vld [vmem:[#allocation5 + $0x70] sm:$0xff] }
  0x40   :  { %415 = vmatpush.msrb.mxu0 %v214_v32  ;;  %472 = vmatpush.msrb.mxu3 %v316_v39  ;;  %v292_v12 = vld [vmem:[#allocation2 + $0x308] sm:$0xff]  ;;  %v522_v24 = vld [vmem:[#allocation5 + $0xf8] sm:$0xff] }
  0x41   :  { %434 = vmatpush.msra.mxu1 %v248_v33  ;;  %455 = vmatpush.msra.mxu2 %v278_v34  ;;  %v506_v27 = vld [vmem:[#allocation5 + $0x78] sm:$0xff]  ;;  %v504_v31 = vld [vmem:[#allocation5 + $0x68] sm:$0xff]  ;;  %v503_v34 = vld [vmem:[#allocation5 + $0x60] sm:$0xff] }
  0x42   :  { %416 = vmatpush.msrb.mxu0 %v212_v36  ;;  %473 = vmatpush.msrb.mxu3 %v314_v43  ;;  %v502_v36 = vld [vmem:[#allocation5 + $0x58] sm:$0xff]  ;;  %v520_v39 = vld [vmem:[#allocation5 + $0xe8] sm:$0xff] }
  0x43   :  { %435 = vmatpush.msra.mxu1 %v246_v37  ;;  %456 = vmatpush.msra.mxu2 %v276_v38  ;;  %v501_v37 = vld [vmem:[#allocation5 + $0x50] sm:$0xff]  ;;  %v500_v38 = vld [vmem:[#allocation5 + $0x48] sm:$0xff]  ;;  %v518_v43 = vld [vmem:[#allocation5 + $0xd8] sm:$0xff] }
  0x44   :  { %417 = vmatpush.msrb.mxu0 %v210_v40  ;;  %474 = vmatpush.msrb.mxu3 %v312_v47  ;;  %v499_v40 = vld [vmem:[#allocation5 + $0x40] sm:$0xff]  ;;  %v516_v47 = vld [vmem:[#allocation5 + $0xc8] sm:$0xff] }
  0x45   :  { %436 = vmatpush.msra.mxu1 %v244_v41  ;;  %457 = vmatpush.msra.mxu2 %v274_v42  ;;  %v519_v41 = vld [vmem:[#allocation5 + $0xe0] sm:$0xff]  ;;  %v498_v42 = vld [vmem:[#allocation5 + $0x38] sm:$0xff] }
  0x46   :  { %418 = vmatpush.msrb.mxu0 %v208_v44  ;;  %475 = vmatpush.msrb.mxu3 %v310_v51  ;;  %v497_v44 = vld [vmem:[#allocation5 + $0x30] sm:$0xff]  ;;  %v514_v51 = vld [vmem:[#allocation5 + $0xb8] sm:$0xff] }
  0x47   :  { %437 = vmatpush.msra.mxu1 %v242_v45  ;;  %458 = vmatpush.msra.mxu2 %v272_v46  ;;  %v517_v45 = vld [vmem:[#allocation5 + $0xd0] sm:$0xff]  ;;  %v496_v46 = vld [vmem:[#allocation5 + $0x28] sm:$0xff] }
  0x48   :  { %419 = vmatpush.msrb.mxu0 %v206_v48  ;;  %476 = vmatpush.msrb.mxu3 %v308_v55  ;;  %v495_v48 = vld [vmem:[#allocation5 + $0x20] sm:$0xff]  ;;  %v512_v55 = vld [vmem:[#allocation5 + $0xa8] sm:$0xff] }
  0x49   :  { %438 = vmatpush.msra.mxu1 %v240_v49  ;;  %459 = vmatpush.msra.mxu2 %v270_v50  ;;  %v515_v49 = vld [vmem:[#allocation5 + $0xc0] sm:$0xff]  ;;  %v494_v50 = vld [vmem:[#allocation5 + $0x18] sm:$0xff] }
  0x4a   :  { %420 = vmatpush.msrb.mxu0 %v204_v52  ;;  %477 = vmatpush.msrb.mxu3 %v306_v59  ;;  %v493_v52 = vld [vmem:[#allocation5 + $0x10] sm:$0xff] }
  0x4b   :  { %439 = vmatpush.msra.mxu1 %v238_v53  ;;  %460 = vmatpush.msra.mxu2 %v268_v54  ;;  %v513_v53 = vld [vmem:[#allocation5 + $0xb0] sm:$0xff]  ;;  %v492_v54 = vld [vmem:[#allocation5 + $0x8] sm:$0xff] }
  0x4c   :  { %421 = vmatpush.msrb.mxu0 %v202_v56  ;;  %478 = vmatpush.msrb.mxu3 %v304_v63  ;;  %v491_v56 = vld [vmem:[#allocation5] sm:$0xff]  ;;  %v509_v59 = vld [vmem:[#allocation5 + $0x90] sm:$0xff] }
  0x4d   :  { %440 = vmatpush.msra.mxu1 %v236_v57  ;;  %461 = vmatpush.msra.mxu2 %v266_v58  ;;  %v511_v57 = vld [vmem:[#allocation5 + $0xa0] sm:$0xff]  ;;  %v510_v58 = vld [vmem:[#allocation5 + $0x98] sm:$0xff]  ;;  %v582_v63 = vld [vmem:[%s1013_s7 + $0x70] sm:$0xff] }
  0x4e   :  { %422 = vmatpush.msrb.mxu0 %v200_v60  ;;  %479 = vmatpush.msrb.mxu3 %v302_v3  ;;  %v508_v60 = vld [vmem:[#allocation5 + $0x88] sm:$0xff]  ;;  %v579_v3 = vld [vmem:[%s1013_s7 + $0x58] sm:$0xff] }
  0x4f   :  { %441 = vmatpush.msra.mxu1 %v234_v61  ;;  %462 = vmatpush.msra.mxu2 %v264_v62  ;;  %v507_v61 = vld [vmem:[#allocation5 + $0x80] sm:$0xff]  ;;  %v583_v62 = vld [vmem:[%s1013_s7 + $0x78] sm:$0xff] }
  0x50   :  { %423 = vmatpush.msrb.mxu0 %v198_v0  ;;  %480 = vmatpush.msrb.mxu3 %v300_v7  ;;  %v581_v0 = vld [vmem:[%s1013_s7 + $0x68] sm:$0xff] }
  0x51   :  { %442 = vmatpush.msra.mxu1 %v232_v1  ;;  %463 = vmatpush.msra.mxu2 %v262_v2  ;;  %v580_v1 = vld [vmem:[%s1013_s7 + $0x60] sm:$0xff]  ;;  %v577_v7 = vld [vmem:[%s1013_s7 + $0x48] sm:$0xff] }
  0x52   :  { %424 = vmatpush.msrb.mxu0 %v196_v4  ;;  %481 = vmatpush.msrb.mxu3 %v298_v9  ;;  %v323_v2 = vld [vmem:[%s1010_s4] sm:$0x3] }
  0x53   :  { %443 = vmatpush.msra.mxu1 %v230_v5  ;;  %464 = vmatpush.msra.mxu2 %v260_v6  ;;  %v325_v5 = vperm.slane %v323_v2, 0  ;;  %v578_v6 = vld [vmem:[%s1013_s7 + $0x50] sm:$0xff] }
  0x54   :  { %482 = vmatpush.msrb.mxu3 %v296_v10  ;;  %v576_v10 = vld [vmem:[%s1013_s7 + $0x40] sm:$0xff] }
  0x55   :  { %444 = vmatpush.msra.mxu1 %v228_v8 }
  0x56   :  { %483 = vmatpush.msrb.mxu3 %v294_v11 }
  0x58   :  { %484 = vmatpush.msrb.mxu3 %v292_v12  ;;  %v575_v12 = vld [vmem:[%s1013_s7 + $0x38] sm:$0xff] }
  0x92   :  { %v148_v17 = vpop.f32.mrf.mxu1 }
  0x93   :  { %v149_v18 = vadd.f32 %v148_v17, %v87_v14  ;;  %v326_v14 = vperm.slane %v323_v2, 1 }
  0x95   :  { %v128_v19 = vpop.f32.mrf.mxu3  ;;  %v192_v23 = vmax.f32 %v149_v18, 0.0 }
  0x96   :  { %v168_v20 = vpop.f32.mrf.mxu2  ;;  %v129_v21 = vadd.f32 %v128_v19, %v86_v15 }
  0x97   :  { %v169_v22 = vadd.f32 %v168_v20, %v88_v16  ;;  %365 = vmatmul.f32.vlgmr.msrb.gmra.mxu1 %v192_v23 }
  0x98   :  { %v191_v25 = vmax.f32 %v129_v21, 0.0  ;;  %547 = vmatpush.msrb.mxu1 %v522_v24 }
  0x99   :  { %v193_v26 = vmax.f32 %v169_v22, 0.0 }
  0x9a   :  { %345 = vmatmul.f32.vlgmr.msra.gmra.mxu0 %v191_v25  ;;  %548 = vmatpush.msrb.mxu1 %v521_v28  ;;  %v574_v28 = vld [vmem:[%s1013_s7 + $0x30] sm:$0xff] }
  0x9b   :  { %385 = vmatmul.f32.vlgmr.msrb.gmra.mxu2 %v193_v26  ;;  %527 = vmatpush.msra.mxu0 %v506_v27 }
  0x9c   :  { %549 = vmatpush.msrb.mxu1 %v520_v39  ;;  %588 = vmatpush.msrb.mxu2 %v583_v62  ;;  %v612_v39 = vld [vmem:[%s1015_s9 + $0x18] sm:$0xff] }
  0x9d   :  { %v188_v32 = vpop.f32.mrf.mxu3  ;;  %528 = vmatpush.msra.mxu0 %v505_v30  ;;  %v572_v30 = vld [vmem:[%s1013_s7 + $0x20] sm:$0xff] }
  0x9e   :  { %v189_v33 = vadd.f32 %v188_v32, %v89_v29  ;;  %550 = vmatpush.msrb.mxu1 %v519_v41  ;;  %589 = vmatpush.msrb.mxu2 %v582_v63  ;;  %v573_v29 = vld [vmem:[%s1013_s7 + $0x28] sm:$0xff]  ;;  %v570_v32 = vld [vmem:[%s1013_s7 + $0x10] sm:$0xff] }
  0x9f   :  { %529 = vmatpush.msra.mxu0 %v504_v31  ;;  %445 = vmatmul.f32.vlgmr.msra.gmra.mxu1 %v192_v23  ;;  %v571_v31 = vld [vmem:[%s1013_s7 + $0x18] sm:$0xff] }
  0xa0   :  { %v194_v35 = vmax.f32 %v189_v33, 0.0  ;;  %551 = vmatpush.msrb.mxu1 %v518_v43  ;;  %590 = vmatpush.msrb.mxu2 %v581_v0  ;;  %v569_v33 = vld [vmem:[%s1013_s7 + $0x8] sm:$0xff] }
  0xa1   :  { %530 = vmatpush.msra.mxu0 %v503_v34  ;;  %v568_v34 = vld [vmem:[%s1013_s7] sm:$0xff] }
  0xa2   :  { %405 = vmatmul.f32.vlgmr.msra.gmra.mxu3 %v194_v35  ;;  %425 = vmatmul.f32.vlgmr.msrb.gmra.mxu0 %v191_v25 }
  0xa3   :  { %465 = vmatmul.f32.vlgmr.msra.gmra.mxu2 %v193_v26  ;;  %531 = vmatpush.msra.mxu0 %v502_v36  ;;  %v615_v36 = vld [vmem:[%s1015_s9 + $0x30] sm:$0xff] }
  0xa4   :  { %552 = vmatpush.msrb.mxu1 %v517_v45  ;;  %591 = vmatpush.msrb.mxu2 %v580_v1 }
  0xa5   :  { %532 = vmatpush.msra.mxu0 %v501_v37  ;;  %v614_v37 = vld [vmem:[%s1015_s9 + $0x28] sm:$0xff] }
  0xa6   :  { %553 = vmatpush.msrb.mxu1 %v516_v47  ;;  %592 = vmatpush.msrb.mxu2 %v579_v3  ;;  %v610_v47 = vld [vmem:[%s1015_s9 + $0x8] sm:$0xff] }
  0xa7   :  { %533 = vmatpush.msra.mxu0 %v500_v38  ;;  %v613_v38 = vld [vmem:[%s1015_s9 + $0x20] sm:$0xff] }
  0xa8   :  { %554 = vmatpush.msrb.mxu1 %v515_v49  ;;  %593 = vmatpush.msrb.mxu2 %v578_v6  ;;  %v710_v49 = vld [vmem:[%s1014_s8] ss:$0 sm:$0xff]  ;;  %s800_s8 = smov [#allocation7]  }
  0xa9   :  { %534 = vmatpush.msra.mxu0 %v499_v40  ;;  %v709_v40 = vld [vmem:[%s1012_s6] ss:$0 sm:$0xff] }
  0xaa   :  { %485 = vmatmul.f32.vlgmr.msrb.gmra.mxu3 %v194_v35  ;;  %555 = vmatpush.msrb.mxu1 %v514_v51  ;;  %v616_v35 = vld [vmem:[%s1015_s9 + $0x38] sm:$0xff] }
  0xab   :  { %535 = vmatpush.msra.mxu0 %v498_v42  ;;  %594 = vmatpush.msrb.mxu2 %v577_v7 }
  0xac   :  { %556 = vmatpush.msrb.mxu1 %v513_v53  ;;  %633 = vmatpush.msra.mxu3 %v616_v35  ;;  %v645_v53 = vlaneseq }
  0xad   :  { %536 = vmatpush.msra.mxu0 %v497_v44  ;;  %595 = vmatpush.msrb.mxu2 %v576_v10 }
  0xae   :  { %557 = vmatpush.msrb.mxu1 %v512_v55  ;;  %634 = vmatpush.msra.mxu3 %v615_v36  ;;  %v646_v55 = vand.u32 127, %v645_v53 }
  0xaf   :  { %537 = vmatpush.msra.mxu0 %v496_v46  ;;  %596 = vmatpush.msrb.mxu2 %v575_v12  ;;  %v611_v46 = vld [vmem:[%s1015_s9 + $0x10] sm:$0xff] }
  0xb0   :  { %558 = vmatpush.msrb.mxu1 %v511_v57  ;;  %635 = vmatpush.msra.mxu3 %v614_v37  ;;  %vm647_vm3 = vcmp.eq.s32.totalorder %v646_v55, 1 }
  0xb1   :  { %538 = vmatpush.msra.mxu0 %v495_v48  ;;  %597 = vmatpush.msrb.mxu2 %v574_v28  ;;  %v609_v48 = vld [vmem:[%s1015_s9] sm:$0xff]  ;;  %s678_s9 = sshll.u32 %s800_s8, 4  ;;  %s679_s9 = int_to_ptr.vmem [resolvable:$true] %s678_s9 }
  0xb2   :  { %559 = vmatpush.msrb.mxu1 %v510_v58  ;;  %636 = vmatpush.msra.mxu3 %v613_v38 }
  0xb3   :  { %539 = vmatpush.msra.mxu0 %v494_v50  ;;  %598 = vmatpush.msrb.mxu2 %v573_v29 }
  0xb4   :  { %560 = vmatpush.msrb.mxu1 %v509_v59  ;;  %637 = vmatpush.msra.mxu3 %v612_v39 }
  0xb5   :  { %540 = vmatpush.msra.mxu0 %v493_v52  ;;  %599 = vmatpush.msrb.mxu2 %v572_v30 }
  0xb6   :  { %561 = vmatpush.msrb.mxu1 %v508_v60  ;;  %638 = vmatpush.msra.mxu3 %v611_v46 }
  0xb7   :  { %541 = vmatpush.msra.mxu0 %v492_v54  ;;  %600 = vmatpush.msrb.mxu2 %v571_v31  ;;  %v711_v54 = vld [vmem:[%s1016_s10] ss:$0 sm:$0xff] }
  0xb8   :  { %562 = vmatpush.msrb.mxu1 %v507_v61  ;;  %639 = vmatpush.msra.mxu3 %v610_v47 }
  0xb9   :  { %542 = vmatpush.msra.mxu0 %v491_v56  ;;  %601 = vmatpush.msrb.mxu2 %v570_v32 }
  0xba   :  { %640 = vmatpush.msra.mxu3 %v609_v48 }
  0xbb   :  { %602 = vmatpush.msrb.mxu2 %v569_v33 }
  0xbd   :  { %603 = vmatpush.msrb.mxu2 %v568_v34 }
 0x114   :  { %v366_v8 = vpop.f32.mrf.mxu1 }
 0x117   :  { %v346_v4 = vpop.f32.mrf.mxu0 }
 0x118   :  { %v347_v9 = vadd.f32 %v346_v4, %v325_v5 }
 0x11a   :  { %v367_v13 = vadd.f32 %v366_v8, %v347_v9 }
 0x11c   :  { %v446_v20 = vpop.f32.mrf.mxu1 }
 0x11e   :  { %v386_v11 = vpop.f32.mrf.mxu2 }
 0x11f   :  { %v426_v15 = vpop.f32.mrf.mxu0  ;;  %v387_v16 = vadd.f32 %v386_v11, %v367_v13 }
 0x120   :  { %v427_v18 = vadd.f32 %v426_v15, %v326_v14 }
 0x122   :  { %v447_v23 = vadd.f32 %v446_v20, %v427_v18 }
 0x125   :  { %v406_v17 = vpop.f32.mrf.mxu3 }
 0x126   :  { %v407_v19 = vadd.f32 %v406_v17, %v387_v16  ;;  %v466_v22 = vpop.f32.mrf.mxu2 }
 0x127   :  { %v467_v24 = vadd.f32 %v466_v22, %v447_v23 }
 0x128   :  { %v489_v21 = vmax.f32 %v407_v19, 0.0 }
 0x12a   :  { %543 = vmatmul.f32.vlgmr.msra.gmra.mxu0 %v489_v21 }
 0x12d   :  { %v486_v25 = vpop.f32.mrf.mxu3 }
 0x12e   :  { %v487_v26 = vadd.f32 %v486_v25, %v467_v24 }
 0x130   :  { %v490_v27 = vmax.f32 %v487_v26, 0.0 }
 0x132   :  { %563 = vmatmul.f32.vlgmr.msrb.gmra.mxu1 %v490_v27 }
 0x1a7   :  { %v544_v41 = vpop.f32.mrf.mxu0 }
 0x1a8   :  { %v545_v42 = vadd.f32 %v709_v40, %v544_v41 }
 0x1af   :  { %v564_v43 = vpop.f32.mrf.mxu1 }
 0x1b0   :  { %v565_v44 = vadd.f32 %v564_v43, %v545_v42 }
 0x1b2   :  { %v567_v45 = vmax.f32 %v565_v44, 0.0 }
 0x1b4   :  { %604 = vmatmul.f32.vlgmr.msrb.gmra.mxu2 %v567_v45 }
 0x237   :  { %v605_v50 = vpop.f32.mrf.mxu2 }
 0x238   :  { %v606_v51 = vadd.f32 %v710_v49, %v605_v50 }
 0x23a   :  { %v608_v52 = vmax.f32 %v606_v51, 0.0 }
 0x23c   :  { %699 = vmatmul.msk.f32.vlgmr.msra.gmra.mxu3 %vm621_vm2, %v608_v52 }
 0x2bf   :  { %v642_v56 = vpop.f32.mrf.mxu3 }
 0x2c0   :  { %v643_v57 = vadd.f32 %v711_v54, %v642_v56 }
 0x2c2   :  { %v648_v58 = vmul.f32 2.0, %v643_v57 }
 0x2c4   :  { %v649_v59 = vsel %vm647_vm3, %v648_v58, %v643_v57 }
 0x2c5   :  { %v700_v60 = vmul.f32 -1.442695, %v649_v59 }
 0x2c7   :  { %712 = vpow2.f32 %v700_v60 }
 0x2cd   :  { %v713_v61 = vpop.eup %712 }
 0x2ce   :  { %v653_v62 = vadd.f32 1.0, %v713_v61 }
 0x2d0   :  { %714 = vrcp.f32 %v653_v62  ;;  %v665_v2 = vand.u32 2147483648, %v653_v62  ;;  %v663_v4 = vand.u32 2147483647, %v653_v62  ;;  %vm659_vm5 = vweird.f32 %v653_v62 }
 0x2d2   :  { %v666_v6 = vor.u32 1.1754944e-38, %v665_v2  ;;  %vm664_vm7 = vcmp.eq.f32.partialorder %v663_v4, 8.507059e+37 }
 0x2d6   :  { %v715_v63 = vpop.eup %714 }
 0x2d7   :  { %v655_v0 = vmul.f32 %v715_v63, %v653_v62  ;;  %vm660_vm4 = vweird.f32 %v715_v63 }
 0x2d8   :  { %vm661_vm6 = vmor %vm659_vm5, %vm660_vm4 }
 0x2d9   :  { %v656_v1 = vsub.f32 1.0, %v655_v0 }
 0x2db   :  { %v657_v3 = vmul.f32 %v715_v63, %v656_v1 }
 0x2dd   :  { %v658_v5 = vadd.f32 %v715_v63, %v657_v3 }
 0x2df   :  { %v662_v7 = vsel %vm661_vm6, %v715_v63, %v658_v5 }
 0x2e0   :  { %v667_v8 = vsel %vm664_vm7, %v666_v6, %v662_v7 }
 0x2e1   :  { %v669_v9 = vmul.f32 2.0, %v667_v8 }
 0x2e3   :  { %v701_v10 = vadd.f32 -1.0, %v669_v9 }
 0x2e5   :  { %v671_v11 = vsel %vm647_vm3, %v701_v10, %v667_v8 }
 0x2e6   :  { %672 = vst [vmem:[#allocation7] sm:$0xff] %v671_v11 }
 0x2e7   :  { %683 = dma.vmem_to_hbm [thread:$0]  %s679_s9, 128, %s681_s19, [#allocation4]  }
 0x2e8   :  { %792 = dma.done.wait [#allocation4], 128  }
 0x2e9   :  { %793 = vsyncadd [#allocation4], 4294967168 }
 0x2ea   :  { %688 = vsyncpa [#allocation3], 1 }
 0x2eb   :  { %689 = vsyncpa [#allocation6], 1 }
 0x2ec   :  { %690 = vsyncpa [#allocation4], 1 }

</bundles_post_ra>
